<compile_context>
chip_gen: v6e
topology: v6e:2x2x1
jax: 0.10.0
libtpu: 0.0.40
codegen_flags: <defaults>
</compile_context>

<pallas_src>
import functools

import jax
import jax.numpy as jnp
import numpy as np
from jax import lax
from jax.experimental import pallas as pl
from jax.experimental.pallas import tpu as pltpu


def _round_up(x, m):
    return (x + m - 1) // m * m


def _l2_normalize(x):
    # torch F.normalize(dim=-1): x / max(||x||, 1e-12) == x * rsqrt(max(||x||^2, 1e-24))
    xf = x.astype(jnp.float32)
    sq = jnp.sum(xf * xf, axis=-1, keepdims=True)
    return xf * lax.rsqrt(jnp.maximum(sq, 1e-24))


def _signed_power(s, p_factor):
    """sign(s) * |s|^p; pure-VPU fast path for small integer exponents."""
    p = float(p_factor)
    if p.is_integer() and 1.0 <= p <= 8.0:
        n = int(p)
        out = s                      # == sign(s) * |s|^1
        if n > 1:
            s_abs = jnp.abs(s)
            for _ in range(n - 1):   # out -> sign(s) * |s|^n
                out = out * s_abs
        return out
    # generic (non-integer) exponent: falls back to transcendental pow
    return jnp.sign(s) * jnp.power(jnp.abs(s), p)


def _minerva2_kernel(p_factor, matmul_dtype,
                     feat_ref, exft_ref, excls_ref, echo_ref, a_ref):
    # grid = (core_split, B-tile, N-tile); reduction axis (N-tile) is last.
    j = pl.program_id(2)

    # All inputs are pre-normalized / pre-cast in the wrapper.
    # s = fn @ efn.T, as a plain [TB,H] x [H,TN] contraction (exemplars pre-transposed).
    s = jnp.dot(feat_ref[...], exft_ref[...],
                preferred_element_type=jnp.float32)                # (TB, TN) f32

    a = _signed_power(s, p_factor)                                 # (TB, TN) f32
    a_ref[...] = a.astype(a_ref.dtype)

    # echo partial contribution for this exemplar tile
    contrib = jnp.dot(a.astype(matmul_dtype), excls_ref[...],
                      preferred_element_type=jnp.float32)          # (TB, C) f32

    @pl.when(j == 0)
    def _():
        echo_ref[...] = contrib

    @pl.when(j != 0)
    def _():
        echo_ref[...] += contrib


def _vmem_capacity_bytes():
    try:
        return int(pltpu.get_tpu_info().vmem_capacity_bytes)
    except Exception:
        return 64 * 1024 * 1024          # conservative (v7x-sized) fallback


def _make_plan(B, H, N, C, matmul_dtype=jnp.float32,
               block_b=512, max_block_n=4096, n_core_splits=None):
    """Tile / padding / VMEM plan (all Python ints; cache alongside prepared exemplars)."""
    dsize = jnp.dtype(matmul_dtype).itemsize

    TB = min(_round_up(B, 8), _round_up(block_b, 8))
    Bp = _round_up(B, TB)
    nb = Bp // TB

    # Core-split over N: gives the second TensorCore work on v7x when B fits
    # in a single tile.  Harmless (tiny wrapper-side sum) on v5e/v6e.
    S = n_core_splits
    if S is None:
        S = 2 if (nb == 1 and N >= 256) else 1

    # Generation-aware VMEM sizing.
    phys = _vmem_capacity_bytes()
    if phys >= 128 * 1024 * 1024:        # v5e / v6e
        budget, vmem_limit = 88 << 20, 100 << 20
    elif phys >= 64 * 1024 * 1024:       # v7x
        budget, vmem_limit = 40 << 20, 48 << 20
    else:
        budget, vmem_limit = phys // 2, phys * 5 // 8

    # Corrected footprint accounting (BlockSpec double-buffers every operand).
    fixed = (2 * TB * H * dsize          # features tile       x2 buffers
             + 2 * TB * C * 4)           # resident echo block x2 buffers (f32)
    per_tn = (2 * H * dsize              # ex_features^T tile column x2 buffers
              + 2 * C * dsize            # ex_class_reps tile row    x2 buffers
              + 2 * TB * 4               # `a` output tile           x2 buffers (f32)
              + 3 * TB * 4)              # in-kernel f32 temporaries (s, a, casts)
    tn_cap = max(128, (budget - fixed) // per_tn // 128 * 128)

    n_split = -(-N // S)                 # exemplars per core split (cdiv)
    TN = min(_round_up(n_split, 128), _round_up(max_block_n, 128), tn_cap)
    Ns = _round_up(n_split, TN)          # padded exemplars per split
    Np = S * Ns
    nj = Ns // TN

    return dict(TB=TB, Bp=Bp, nb=nb, S=S, TN=TN, Ns=Ns, Np=Np, nj=nj,
                vmem_limit=int(vmem_limit), matmul_dtype=matmul_dtype)


def minerva2_prepare(ex_features, ex_class_reps, plan):
    """Normalize, cast, transpose and pad the (fixed) exemplar memory once.

    Minerva2's exemplar store does not change across queries: cache the result
    and pass it as `prepared=` to minerva2_forward to avoid re-materializing
    (and re-streaming) full padded copies on every call.
    """
    N, H = ex_features.shape
    dt = plan["matmul_dtype"]
    Np = plan["Np"]
    efn = _l2_normalize(ex_features)                                    # (N, H) f32
    exf_t = jnp.pad(efn.T.astype(dt), ((0, 0), (0, Np - N)))            # (H, Np)
    excls = jnp.pad(ex_class_reps.astype(dt), ((0, Np - N), (0, 0)))    # (Np, C)
    return exf_t, excls


def minerva2_forward(features, ex_features, ex_class_reps, p_factor=1.0,
                     use_sm=False, normalize_a=False,
                     matmul_dtype=jnp.float32,
                     block_b=512, max_block_n=4096, n_core_splits=None,
                     plan=None, prepared=None):
    """Pallas implementation of minerva2.forward.  Returns (echo, a)."""
    if use_sm or normalize_a:
        # TODO(synk): use_sm (softmax over exemplars) and normalize_a (L1 renorm of a)
        # branches are not implemented; module defaults (False/False) are covered.
        raise NotImplementedError("use_sm / normalize_a branches not implemented")

    B, H = features.shape
    N, H2 = ex_features.shape
    N2, C = ex_class_reps.shape
    assert H == H2 and N == N2

    if plan is None:
        plan = _make_plan(B, H, N, C, matmul_dtype, block_b, max_block_n, n_core_splits)
    if prepared is None:
        prepared = minerva2_prepare(ex_features, ex_class_reps, plan)
    exf_t, excls = prepared

    TB, Bp, nb = plan["TB"], plan["Bp"], plan["nb"]
    S, TN, Np, nj = plan["S"], plan["TN"], plan["Np"], plan["nj"]
    dt = plan["matmul_dtype"]
    assert Bp >= B and TB % 8 == 0 and TN % 128 == 0

    # Query-side normalization hoisted out of the kernel (B x H is tiny).
    fn = _l2_normalize(features)                                        # (B, H) f32
    feat_p = jnp.pad(fn.astype(dt), ((0, Bp - B), (0, 0)))              # (Bp, H)

    grid = (S, nb, nj)
    kernel = functools.partial(_minerva2_kernel, float(p_factor), dt)

    echo_p, a_p = pl.pallas_call(
        kernel,
        out_shape=(jax.ShapeDtypeStruct((S * Bp, C), jnp.float32),      # per-split echo
                   jax.ShapeDtypeStruct((Bp, Np), jnp.float32)),        # a
        grid=grid,
        in_specs=[
            pl.BlockSpec((TB, H), lambda s, i, j: (i, 0)),              # normalized features
            pl.BlockSpec((H, TN), lambda s, i, j: (0, s * nj + j)),     # normalized ex_features^T
            pl.BlockSpec((TN, C), lambda s, i, j: (s * nj + j, 0)),     # ex_class_reps
        ],
        out_specs=(
            pl.BlockSpec((TB, C), lambda s, i, j: (s * nb + i, 0)),     # echo (resident over j)
            pl.BlockSpec((TB, TN), lambda s, i, j: (i, s * nj + j)),    # a (lane-dense tiles)
        ),
        compiler_params=pltpu.CompilerParams(
            dimension_semantics=("parallel", "parallel", "arbitrary"),
            vmem_limit_bytes=plan["vmem_limit"]),
    )(feat_p, exf_t, excls)

    echo = echo_p.reshape(S, Bp, C).sum(axis=0) if S > 1 else echo_p
    return echo[:B, :C], a_p[:B, :N]


def _reference(features, ex_features, ex_class_reps, p_factor):
    hp = lax.Precision.HIGHEST
    fn = features / jnp.maximum(
        jnp.linalg.norm(features, axis=1, keepdims=True), 1e-12)
    efn = ex_features / jnp.maximum(
        jnp.linalg.norm(ex_features, axis=1, keepdims=True), 1e-12)
    s = jnp.matmul(fn, efn.T, precision=hp)
    a = jnp.sign(s) * jnp.abs(s) ** p_factor
    echo = jnp.matmul(a, ex_class_reps, precision=hp)
    return echo, a


if __name__ == "__main__":
    p_factor = 3.0
    key = jax.random.PRNGKey(0)
    k1, k2, k3, k4, k5, k6 = jax.random.split(key, 6)

    # --- small config (module demo scale): fp32 path + bf16 MXU-operand path ---
    B, H, N, C = 8, 32, 64, 8
    features = jax.random.normal(k1, (B, H), dtype=jnp.float32)
    ex_features = jax.random.normal(k2, (N, H), dtype=jnp.float32)
    ex_class_reps = jax.random.normal(k3, (N, C), dtype=jnp.float32)
    echo_ref, a_ref = _reference(features, ex_features, ex_class_reps, p_factor)

    echo, a = jax.block_until_ready(
        minerva2_forward(features, ex_features, ex_class_reps, p_factor))
    np.testing.assert_allclose(np.asarray(echo), np.asarray(echo_ref), rtol=2e-4, atol=2e-4)
    np.testing.assert_allclose(np.asarray(a), np.asarray(a_ref), rtol=2e-4, atol=2e-4)
    assert echo.shape == (B, C) and a.shape == (B, N)

    # bf16 exemplar storage + bf16 MXU operands (fp32 accumulation), looser tolerance.
    echo_b, a_b = jax.block_until_ready(
        minerva2_forward(features, ex_features, ex_class_reps, p_factor,
                         matmul_dtype=jnp.bfloat16))
    np.testing.assert_allclose(np.asarray(echo_b), np.asarray(echo_ref), rtol=3e-2, atol=3e-2)
    np.testing.assert_allclose(np.asarray(a_b), np.asarray(a_ref), rtol=3e-2, atol=3e-2)

    # --- larger exemplar store: exercises the N core-split (v7x megacore) path
    #     and the cached / pre-prepared exemplar memory. ---
    B2, H2, N2, C2 = 4, 32, 512, 8
    features2 = jax.random.normal(k4, (B2, H2), dtype=jnp.float32)
    ex_features2 = jax.random.normal(k5, (N2, H2), dtype=jnp.float32)
    ex_class_reps2 = jax.random.normal(k6, (N2, C2), dtype=jnp.float32)
    echo_ref2, a_ref2 = _reference(features2, ex_features2, ex_class_reps2, p_factor)

    plan2 = _make_plan(B2, H2, N2, C2, matmul_dtype=jnp.float32)
    prepared2 = minerva2_prepare(ex_features2, ex_class_reps2, plan2)   # cache across queries
    echo2, a2 = jax.block_until_ready(
        minerva2_forward(features2, ex_features2, ex_class_reps2, p_factor,
                         plan=plan2, prepared=prepared2))
    np.testing.assert_allclose(np.asarray(echo2), np.asarray(echo_ref2), rtol=2e-3, atol=2e-3)
    np.testing.assert_allclose(np.asarray(a2), np.asarray(a_ref2), rtol=2e-3, atol=2e-3)
    assert echo2.shape == (B2, C2) and a2.shape == (B2, N2)

    print("KERNEL_OK")
</pallas_src>

<mosaic_0001>
module attributes {stable_mosaic.version = 11 : i64} {
  func.func @_minerva2_kernel(%arg0: i32, %arg1: i32, %arg2: i32, %arg3: memref<8x32xf32, #tpu.memory_space<vmem>>, %arg4: memref<32x128xf32, #tpu.memory_space<vmem>>, %arg5: memref<128x8xf32, #tpu.memory_space<vmem>>, %arg6: memref<8x8xf32, #tpu.memory_space<vmem>>, %arg7: memref<8x128xf32, #tpu.memory_space<vmem>>) attributes {dimension_semantics = [#tpu.dimension_semantics<parallel>, #tpu.dimension_semantics<parallel>, #tpu.dimension_semantics<arbitrary>], iteration_bounds = array<i64: 1, 1, 1>, scalar_prefetch = 0 : i64, scratch_operands = 0 : i64, tpu.core_type = #tpu.core_type<tc>, window_params = [{transform_indices = @transform_0, window_bounds = array<i64: 8, 32>}, {transform_indices = @transform_1, window_bounds = array<i64: 32, 128>}, {transform_indices = @transform_2, window_bounds = array<i64: 128, 8>}, {transform_indices = @transform_3, window_bounds = array<i64: 8, 8>}, {transform_indices = @transform_4, window_bounds = array<i64: 8, 128>}]} {
    %c0 = arith.constant 0 : index
    %c0_0 = arith.constant 0 : index
    %0 = vector.load %arg3[%c0, %c0_0] : memref<8x32xf32, #tpu.memory_space<vmem>>, vector<8x32xf32>
    %c0_1 = arith.constant 0 : index
    %c0_2 = arith.constant 0 : index
    %1 = vector.load %arg4[%c0_1, %c0_2] : memref<32x128xf32, #tpu.memory_space<vmem>>, vector<32x128xf32>
    %cst = arith.constant dense<0.000000e+00> : vector<8x128xf32>
    %2 = tpu.matmul %0, %1, %cst {dimension_numbers = #tpu.dot_dimension_numbers<[1], [0], [0], [1], [0, 0, 1, 1], [], []>} : vector<8x32xf32>, vector<32x128xf32>, vector<8x128xf32> -> vector<8x128xf32>
    %3 = math.absf %2 : vector<8x128xf32>
    %4 = arith.mulf %2, %3 : vector<8x128xf32>
    %5 = arith.mulf %4, %3 : vector<8x128xf32>
    %c0_3 = arith.constant 0 : index
    %c0_4 = arith.constant 0 : index
    %6 = vector.load %arg7[%c0_3, %c0_4] : memref<8x128xf32, #tpu.memory_space<vmem>>, vector<8x128xf32>
    tpu.vector_store %arg7[%c0_3, %c0_4], %5 {strides = array<i32>} : memref<8x128xf32, #tpu.memory_space<vmem>>, vector<8x128xf32>,
    %c0_5 = arith.constant 0 : index
    %c0_6 = arith.constant 0 : index
    %7 = vector.load %arg5[%c0_5, %c0_6] : memref<128x8xf32, #tpu.memory_space<vmem>>, vector<128x8xf32>
    %cst_7 = arith.constant dense<0.000000e+00> : vector<8x8xf32>
    %8 = tpu.matmul %5, %7, %cst_7 {dimension_numbers = #tpu.dot_dimension_numbers<[1], [0], [0], [1], [0, 0, 1, 1], [], []>} : vector<8x128xf32>, vector<128x8xf32>, vector<8x8xf32> -> vector<8x8xf32>
    %c0_i32 = arith.constant 0 : i32
    %9 = arith.cmpi eq, %arg2, %c0_i32 : i32
    %10 = arith.extui %9 : i1 to i32
    %c0_i32_8 = arith.constant 0 : i32
    %11 = arith.cmpi ne, %10, %c0_i32_8 : i32
    scf.if %11 {
      %c0_11 = arith.constant 0 : index
      %c0_12 = arith.constant 0 : index
      %15 = vector.load %arg6[%c0_11, %c0_12] : memref<8x8xf32, #tpu.memory_space<vmem>>, vector<8x8xf32>
      tpu.vector_store %arg6[%c0_11, %c0_12], %8 {strides = array<i32>} : memref<8x8xf32, #tpu.memory_space<vmem>>, vector<8x8xf32>,
    } else {
    }
    %c0_i32_9 = arith.constant 0 : i32
    %12 = arith.cmpi ne, %arg2, %c0_i32_9 : i32
    %13 = arith.extui %12 : i1 to i32
    %c0_i32_10 = arith.constant 0 : i32
    %14 = arith.cmpi ne, %13, %c0_i32_10 : i32
    scf.if %14 {
      %c0_11 = arith.constant 0 : index
      %c0_12 = arith.constant 0 : index
      %15 = vector.load %arg6[%c0_11, %c0_12] : memref<8x8xf32, #tpu.memory_space<vmem>>, vector<8x8xf32>
      %16 = arith.addf %15, %8 : vector<8x8xf32>
      %c0_13 = arith.constant 0 : index
      %c0_14 = arith.constant 0 : index
      %17 = vector.load %arg6[%c0_13, %c0_14] : memref<8x8xf32, #tpu.memory_space<vmem>>, vector<8x8xf32>
      tpu.vector_store %arg6[%c0_13, %c0_14], %16 {strides = array<i32>} : memref<8x8xf32, #tpu.memory_space<vmem>>, vector<8x8xf32>,
    } else {
    }
    return
  }
  func.func @transform_0(%arg0: i32, %arg1: i32, %arg2: i32) -> (i32, i32) {
    %c0_i32 = arith.constant 0 : i32
    %c0_i32_0 = arith.constant 0 : i32
    return %arg1, %c0_i32 : i32, i32
  }
  func.func @transform_1(%arg0: i32, %arg1: i32, %arg2: i32) -> (i32, i32) {
    %c1_i32 = arith.constant 1 : i32
    %0 = arith.muli %arg0, %c1_i32 : i32
    %1 = arith.addi %0, %arg2 : i32
    %c0_i32 = arith.constant 0 : i32
    %c0_i32_0 = arith.constant 0 : i32
    return %c0_i32, %1 : i32, i32
  }
  func.func @transform_2(%arg0: i32, %arg1: i32, %arg2: i32) -> (i32, i32) {
    %c1_i32 = arith.constant 1 : i32
    %0 = arith.muli %arg0, %c1_i32 : i32
    %1 = arith.addi %0, %arg2 : i32
    %c0_i32 = arith.constant 0 : i32
    %c0_i32_0 = arith.constant 0 : i32
    return %1, %c0_i32 : i32, i32
  }
  func.func @transform_3(%arg0: i32, %arg1: i32, %arg2: i32) -> (i32, i32) {
    %c1_i32 = arith.constant 1 : i32
    %0 = arith.muli %arg0, %c1_i32 : i32
    %1 = arith.addi %0, %arg1 : i32
    %c0_i32 = arith.constant 0 : i32
    %c0_i32_0 = arith.constant 0 : i32
    return %1, %c0_i32 : i32, i32
  }
  func.func @transform_4(%arg0: i32, %arg1: i32, %arg2: i32) -> (i32, i32) {
    %c1_i32 = arith.constant 1 : i32
    %0 = arith.muli %arg0, %c1_i32 : i32
    %1 = arith.addi %0, %arg2 : i32
    %c0_i32 = arith.constant 0 : i32
    return %arg1, %1 : i32, i32
  }
}

</mosaic_0001>

<bundles_post_ra>
// kernel: tpu_custom_call.1
= control target key start
LH: loop header
LB: loop body
LE: loop exit
PB: predicated region body
PF: predicated region fallthrough
CT: control target
= control target key end

     0   :  { %10 = vsyncpa [#allocation3], 0  ;;  %v405_v1 = vmov 0.0   ;;  %vm406_vm0 = vmmov 0   ;;  %s527_s0 = inlined_call_operand.vmem [shape: f32[8,32], index: 0, kind: input, shape index: {}]   ;;  %s528_s1 = inlined_call_operand.vmem [shape: f32[32,128], index: 1, kind: input, shape index: {}]   ;;  %s529_s2 = inlined_call_operand.vmem [shape: f32[128,8], index: 2, kind: input, shape index: {}]   ;;  %s530_s3 = inlined_call_operand.hbm [shape: f32[8,8], index: 3, kind: output, shape index: {0}]   ;;  %s531_s4 = inlined_call_operand.hbm [shape: f32[8,128], index: 4, kind: output, shape index: {1}]  }
   0x1   :  { %v63_v0 = vld [vmem:[%s528_s1 + $0x18] sm:$0xff]  ;;  %311 = vmatprep.subr.mxu0 %v405_v1  ;;  %v62_v2 = vld [vmem:[%s528_s1 + $0x10] sm:$0xff]  ;;  %319 = vmatprep.mubr.msk.f32.mxu0 %vm406_vm0, %v405_v1  ;;  %v61_v5 = vld [vmem:[%s528_s1 + $0x8] sm:$0xff] }
   0x2   :  { %v157_v3 = vld [vmem:[%s529_s2 + $0x78] sm:$0xff]  ;;  %312 = vmatpush3.msra.mxu0 %v63_v0  ;;  %322 = vmatprep.subr.mxu1 %v405_v1  ;;  %v156_v4 = vld [vmem:[%s529_s2 + $0x70] sm:$0xff]  ;;  %v155_v6 = vld [vmem:[%s529_s2 + $0x68] sm:$0xff] }
   0x3   :  { %313 = vmatprep.subr.mxu0 %v405_v1  ;;  %323 = vmatpush3.msra.mxu1 %v157_v3  ;;  %v60_v7 = vld [vmem:[%s528_s1] sm:$0xff] }
   0x4   :  { %314 = vmatpush3.msra.mxu0 %v62_v2  ;;  %324 = vmatprep.subr.mxu1 %v405_v1 }
   0x5   :  { %315 = vmatprep.subr.mxu0 %v405_v1  ;;  %325 = vmatpush3.msra.mxu1 %v156_v4 }
   0x6   :  { %11 = vsyncpa [#allocation5], 0  ;;  %316 = vmatpush3.msra.mxu0 %v61_v5  ;;  %v59_v8 = vld [vmem:[%s527_s0] sm:$0xff]  ;;  %vm64_vm1 = vcmask 261120   ;;  %326 = vmatprep.subr.mxu1 %v405_v1  ;;  %v153_v10 = vld [vmem:[%s529_s2 + $0x58] sm:$0xff]  ;;  %s407_s29 = smov [#allocation4]  }
   0x7   :  { %v154_v9 = vld [vmem:[%s529_s2 + $0x60] sm:$0xff]  ;;  %317 = vmatprep.subr.mxu0 %v405_v1  ;;  %327 = vmatpush3.msra.mxu1 %v155_v6  ;;  %v152_v11 = vld [vmem:[%s529_s2 + $0x50] sm:$0xff]  ;;  %v151_v12 = vld [vmem:[%s529_s2 + $0x48] sm:$0xff]  ;;  %s264_s30 = sshll.u32 %s407_s29, 4  ;;  %s265_s30 = int_to_ptr.vmem [resolvable:$true] %s264_s30 }
   0x8   :  { %318 = vmatpush3.msra.mxu0 %v60_v7  ;;  %328 = vmatprep.subr.mxu1 %v405_v1  ;;  %v150_v13 = vld [vmem:[%s529_s2 + $0x40] sm:$0xff]  ;;  %v149_v14 = vld [vmem:[%s529_s2 + $0x38] sm:$0xff]  ;;  %v148_v15 = vld [vmem:[%s529_s2 + $0x30] sm:$0xff]  ;;  %s361_s5 = scalar_lea.vmem %s265_s30, 128  ;;  %p366_p1 = scmp.lt.s32.totalorder %s265_s30, %s265_s30 }
   0x9   :  { %320 = vmatmul.mubr.msk.f32.vlgmr.msra.gmra.mxu0 %vm64_vm1, %v59_v8  ;;  %329 = vmatpush3.msra.mxu1 %v154_v9  ;;  %v147_v16 = vld [vmem:[%s529_s2 + $0x28] sm:$0xff]  ;;  %v146_v17 = vld [vmem:[%s529_s2 + $0x20] sm:$0xff]  ;;  %v145_v18 = vld [vmem:[%s529_s2 + $0x18] sm:$0xff]  ;;  %p362_p0 = scmp.ne.s32.totalorder %s265_s30, %s361_s5  ;;  %p367_p2 = scmp.lt.s32.totalorder %s361_s5, %s361_s5 }
   0xa   :  { %330 = vmatprep.subr.mxu1 %v405_v1  ;;  %354 = vmatprep.mubr.msk.f32.mxu1 %vm406_vm0, %v405_v1  ;;  %v144_v19 = vld [vmem:[%s529_s2 + $0x10] sm:$0xff]  ;;  %v143_v20 = vld [vmem:[%s529_s2 + $0x8] sm:$0xff]  ;;  %v142_v21 = vld [vmem:[%s529_s2] sm:$0xff] }
   0xb   :  { %331 = vmatpush3.msra.mxu1 %v153_v10  ;;  %p368_p3 = por %p367_p2, %p366_p1 }
   0xc   :  { %332 = vmatprep.subr.mxu1 %v405_v1 }
   0xd   :  { %333 = vmatpush3.msra.mxu1 %v152_v11  ;;  %p369_p4 = pnand %p368_p3, %p362_p0 }
   0xe   :  { %334 = vmatprep.subr.mxu1 %v405_v1 }
   0xf   :  { %335 = vmatpush3.msra.mxu1 %v151_v12 }
  0x10   :  { %336 = vmatprep.subr.mxu1 %v405_v1 }
  0x11   :  { %337 = vmatpush3.msra.mxu1 %v150_v13 }
  0x12   :  { %338 = vmatprep.subr.mxu1 %v405_v1 }
  0x13   :  { %339 = vmatpush3.msra.mxu1 %v149_v14 }
  0x14   :  { %340 = vmatprep.subr.mxu1 %v405_v1 }
  0x15   :  { %341 = vmatpush3.msra.mxu1 %v148_v15 }
  0x16   :  { %342 = vmatprep.subr.mxu1 %v405_v1 }
  0x17   :  { %343 = vmatpush3.msra.mxu1 %v147_v16 }
  0x18   :  { %344 = vmatprep.subr.mxu1 %v405_v1 }
  0x19   :  { %345 = vmatpush3.msra.mxu1 %v146_v17 }
  0x1a   :  { %346 = vmatprep.subr.mxu1 %v405_v1 }
  0x1b   :  { %347 = vmatpush3.msra.mxu1 %v145_v18 }
  0x1c   :  { %348 = vmatprep.subr.mxu1 %v405_v1 }
  0x1d   :  { %349 = vmatpush3.msra.mxu1 %v144_v19 }
  0x1e   :  { %350 = vmatprep.subr.mxu1 %v405_v1 }
  0x1f   :  { %351 = vmatpush3.msra.mxu1 %v143_v20 }
  0x20   :  { %352 = vmatprep.subr.mxu1 %v405_v1 }
  0x21   :  { %353 = vmatpush3.msra.mxu1 %v142_v21 }
  0xc9   :  { %v134_v22 = vpop.f32.mrf.mxu0 }
  0xca   :  { %v138_v23 = vand.u32 2147483647, %v134_v22 }
  0xcb   :  { %v321_v24 = vpop.f32.mrf.mxu0 }
  0xcc   :  { %v139_v25 = vmul.f32 %v138_v23, %v134_v22 }
  0xce   :  { %v140_v26 = vmul.f32 %v139_v25, %v138_v23 }
  0xd0   :  { %141 = vst [vmem:[#allocation4] sm:$0xff] %v140_v26  ;;  %355 = vmatmul.mubr.f32.vlgmr.msra.gmra.mxu1 %v140_v26 }
  0xd1   :  { %372 = shalt.err (!%p369_p4)
}
  0xd2   :  { %267 = dma.vmem_to_hbm [thread:$0]  %s265_s30, 128, %s531_s4, [#allocation5]   ;;  %vm232_vm2 = vcmask 64512  }
  0xd3   :  { %s408_s1 = smov [#allocation2]  }
  0xd4   :  { %s251_s7 = sshll.u32 %s408_s1, 4  ;;  %s252_s7 = int_to_ptr.vmem [resolvable:$true] %s251_s7 }
  0xd5   :  { %s381_s0 = scalar_lea.vmem %s252_s7, 128  ;;  %p386_p6 = scmp.lt.s32.totalorder %s252_s7, %s252_s7 }
  0xd6   :  { %p382_p5 = scmp.ne.s32.totalorder %s252_s7, %s381_s0  ;;  %p387_p7 = scmp.lt.s32.totalorder %s381_s0, %s381_s0 }
  0xd8   :  { %p388_p8 = por %p387_p7, %p386_p6 }
  0xda   :  { %p389_p9 = pnand %p388_p8, %p382_p5 }
 0x190   :  { %v224_v27 = vpop.f32.mrf.mxu1 }
 0x191   :  { %233 = vst.msk [vmem:[#allocation2] sm:$0xff] %vm232_vm2, %v224_v27 }
 0x192   :  { %v356_v28 = vpop.f32.mrf.mxu1 }
 0x193   :  { %392 = shalt.err (!%p389_p9)
}
 0x194   :  { %254 = dma.vmem_to_hbm [thread:$0]  %s252_s7, 128, %s530_s3, [#allocation3]  }
 0x195   :  { %401 = dma.done.wait [#allocation3], 128  }
 0x196   :  { %402 = vsyncadd [#allocation3], 4294967168 }
 0x197   :  { %403 = dma.done.wait [#allocation5], 128  }
 0x198   :  { %404 = vsyncadd [#allocation5], 4294967168 }
 0x199   :  { %274 = vsyncpa [#allocation3], 1 }
 0x19a   :  { %275 = vsyncpa [#allocation5], 1 }

</bundles_post_ra>
